<compile_context>
chip_gen: v6e
topology: v6e:2x2x1
jax: 0.10.0
libtpu: 0.0.40
codegen_flags: <defaults>
</compile_context>

<pallas_src>
import functools

import jax
import jax.numpy as jnp
from jax.experimental import pallas as pl
from jax.experimental.pallas import tpu as pltpu


def _round_up(x, m):
    return (x + m - 1) // m * m


def _conv_stats_kernel(a_ref, w_ref, y_ref, stats_ref, *, m_total, tile_m):
    """One M-tile: conv matmul (bf16 in / f32 acc on the MXU) + per-tile BN partial sums.

    a_ref:     (tile_m, K*K*Cin)  bf16 im2col patches for this tile
    w_ref:     (K*K*Cin, Cout)    bf16 block-diagonal weight (VMEM-resident across tiles)
    y_ref:     (tile_m, Cout)     f32 conv output tile
    stats_ref: (1, 2, Cout)       f32 per-tile [sum, sum-of-squares]
    """
    y = jnp.dot(a_ref[...], w_ref[...], preferred_element_type=jnp.float32)
    y_ref[...] = y

    # Mask rows past the true M (patches were zero-padded up to a tile multiple) so the
    # pad rows do not pollute the BatchNorm statistics.
    row = pl.program_id(0) * tile_m + jax.lax.broadcasted_iota(
        jnp.int32, (tile_m, 1), 0)
    ym = jnp.where(row < m_total, y, 0.0)
    s = jnp.sum(ym, axis=0, keepdims=True)            # (1, Cout)
    ss = jnp.sum(ym * ym, axis=0, keepdims=True)      # (1, Cout)
    stats_ref[0] = jnp.concatenate([s, ss], axis=0)   # (2, Cout)


def _bn_silu_kernel(y_ref, scale_ref, shift_ref, o_ref):
    """One M-tile: z = y*scale + shift (folded BN), then SiLU."""
    z = y_ref[...] * scale_ref[...] + shift_ref[...]
    o_ref[...] = (z * jax.nn.sigmoid(z)).astype(o_ref.dtype)


def cnn_block_forward(x, weight, gamma, beta, *, stride, padding, groups, eps=1e-5,
                      tile_m=None):
    """Forward pass of CNNBlock.

    x:      (N, Cin, H, W)            NCHW float32
    weight: (Cout, Cin//groups, K, K) PyTorch OIHW conv weight (bias-free)
    gamma:  (Cout,) BN weight
    beta:   (Cout,) BN bias
    Returns (N, Cout, OH, OW) NCHW.
    """
    N, Cin, H, W = x.shape
    Cout, Cg, K, _ = weight.shape
    G = groups
    assert Cin == G * Cg and Cout % G == 0
    Cog = Cout // G
    s, p = stride, padding
    OH = (H + 2 * p - K) // s + 1
    OW = (W + 2 * p - K) // s + 1
    M = N * OH * OW
    Kdf = K * K * Cin

    # ---- im2col patches, tap ordering (kh, kw, cin), channels on the lane axis ----
    x_nhwc = jnp.transpose(x, (0, 2, 3, 1))
    x_pad = jnp.pad(x_nhwc, ((0, 0), (p, p), (p, p), (0, 0)))
    taps = []
    for kh in range(K):
        for kw in range(K):
            taps.append(x_pad[:, kh:kh + s * (OH - 1) + 1:s,
                              kw:kw + s * (OW - 1) + 1:s, :])
    patches = jnp.stack(taps, axis=3)                  # (N, OH, OW, K*K, Cin)
    a = patches.reshape(M, Kdf)
    # TODO(synk): for production sizes, fold the im2col into the kernel via a K*K
    # "arbitrary" grid axis over shifted windows (avoids the K^2 HBM blowup), and give
    # depthwise (Cg == 1) a dedicated VPU shifted-window path instead of the MXU.

    # ---- block-diagonal weight (K*K*Cin, Cout); rows ordered (kh, kw, cin) ----
    w5 = weight.reshape(G, Cog, Cg, K, K).transpose(3, 4, 0, 2, 1)   # (K, K, G, Cg, Cog)
    w_bd = jnp.einsum('hwgco,gj->hwgcjo', w5, jnp.eye(G, dtype=w5.dtype))
    w_bd = w_bd.reshape(Kdf, Cout)

    # bf16 MXU inputs, f32 accumulation.
    a_bf16 = a.astype(jnp.bfloat16)
    w_bf16 = w_bd.astype(jnp.bfloat16)

    # ---- M tiling: keep double-buffered streaming footprint well under 16 MiB ----
    if tile_m is None:
        budget = 6 * 1024 * 1024
        per_row = 2 * (Kdf * 2) + 2 * (Cout * 4)   # dbl-buffered patches(bf16) + y(f32)
        tile_m = max(8, min(512, (budget // per_row) // 8 * 8))
    tile_m = min(tile_m, _round_up(M, 8))
    m_pad = _round_up(M, tile_m)
    mt = m_pad // tile_m
    a_bf16 = jnp.pad(a_bf16, ((0, m_pad - M), (0, 0)))

    # ---- pass 1: tiled conv matmul + fused per-tile BN partial statistics ----
    y, stats = pl.pallas_call(
        functools.partial(_conv_stats_kernel, m_total=M, tile_m=tile_m),
        out_shape=(jax.ShapeDtypeStruct((m_pad, Cout), jnp.float32),
                   jax.ShapeDtypeStruct((mt, 2, Cout), jnp.float32)),
        grid=(mt,),
        in_specs=[
            pl.BlockSpec((tile_m, Kdf), lambda i: (i, 0)),
            pl.BlockSpec((Kdf, Cout), lambda i: (0, 0)),   # weight resident across tiles
        ],
        out_specs=(
            pl.BlockSpec((tile_m, Cout), lambda i: (i, 0)),
            pl.BlockSpec((1, 2, Cout), lambda i: (i, 0, 0)),
        ),
        compiler_params=pltpu.CompilerParams(dimension_semantics=("parallel",)),
    )(a_bf16, w_bf16)

    # ---- tiny XLA reduction of per-tile stats -> folded BN scale/shift ----
    total = jnp.sum(stats, axis=0)                               # (2, Cout)
    mean = total[0] / M
    var = jnp.maximum(total[1] / M - mean * mean, 0.0)           # biased var (train-mode BN)
    inv_std = jax.lax.rsqrt(var + eps)
    g32 = gamma.astype(jnp.float32)
    scale = (g32 * inv_std).reshape(1, Cout)
    shift = (beta.astype(jnp.float32) - mean * g32 * inv_std).reshape(1, Cout)

    # ---- pass 2: normalize + SiLU over the same M tiles ----
    out = pl.pallas_call(
        _bn_silu_kernel,
        out_shape=jax.ShapeDtypeStruct((m_pad, Cout), x.dtype),
        grid=(mt,),
        in_specs=[
            pl.BlockSpec((tile_m, Cout), lambda i: (i, 0)),
            pl.BlockSpec((1, Cout), lambda i: (0, 0)),
            pl.BlockSpec((1, Cout), lambda i: (0, 0)),
        ],
        out_specs=pl.BlockSpec((tile_m, Cout), lambda i: (i, 0)),
        compiler_params=pltpu.CompilerParams(dimension_semantics=("parallel",)),
    )(y, scale, shift)

    # ---- (M, Cout) -> NCHW ----
    out = out[:M].reshape(N, OH, OW, Cout)
    return jnp.transpose(out, (0, 3, 1, 2))


def _reference_forward(x, weight, gamma, beta, *, stride, padding, groups, eps=1e-5):
    """Pure-JAX reference of the module forward (conv -> train-mode BN -> SiLU)."""
    y = jax.lax.conv_general_dilated(
        x, weight, window_strides=(stride, stride),
        padding=[(padding, padding), (padding, padding)],
        dimension_numbers=("NCHW", "OIHW", "NCHW"),
        feature_group_count=groups,
        precision=jax.lax.Precision.HIGHEST)
    mean = jnp.mean(y, axis=(0, 2, 3), keepdims=True)
    var = jnp.mean((y - mean) ** 2, axis=(0, 2, 3), keepdims=True)
    z = (y - mean) / jnp.sqrt(var + eps) * gamma.reshape(1, -1, 1, 1) \
        + beta.reshape(1, -1, 1, 1)
    return z * jax.nn.sigmoid(z)


def _make_params(key, in_channels, out_channels, kernel_size, groups):
    kw_, kg_, kb_ = jax.random.split(key, 3)
    weight = 0.1 * jax.random.normal(
        kw_, (out_channels, in_channels // groups, kernel_size, kernel_size),
        dtype=jnp.float32)
    gamma = 1.0 + 0.1 * jax.random.normal(kg_, (out_channels,), dtype=jnp.float32)
    beta = 0.1 * jax.random.normal(kb_, (out_channels,), dtype=jnp.float32)
    return weight, gamma, beta


if __name__ == "__main__":
    key = jax.random.PRNGKey(0)
    kx, kp1, kp2, kp3 = jax.random.split(key, 4)

    def _bf16(t):
        return t.astype(jnp.bfloat16).astype(jnp.float32)

    def _check(x_, w_, g_, b_, *, stride, padding, groups, exp_shape, tile_m=None):
        out = cnn_block_forward(x_, w_, g_, b_, stride=stride, padding=padding,
                                groups=groups, tile_m=tile_m)
        jax.block_until_ready(out)
        assert out.shape == exp_shape, out.shape
        # Tight check: reference fed the same bf16-rounded MXU inputs as the kernel
        # (differences are f32 accumulation order only).
        ref_t = _reference_forward(_bf16(x_), _bf16(w_), g_, b_,
                                   stride=stride, padding=padding, groups=groups)
        assert jnp.allclose(out, ref_t, rtol=1e-3, atol=1e-3), \
            float(jnp.max(jnp.abs(out - ref_t)))
        # Loose sanity check against the pure-f32 module semantics; the only difference
        # is bf16 rounding of the MXU inputs.
        ref_f = _reference_forward(x_, w_, g_, b_, stride=stride, padding=padding,
                                   groups=groups)
        assert jnp.allclose(out, ref_f, rtol=5e-2, atol=5e-2), \
            float(jnp.max(jnp.abs(out - ref_f)))

    x = jax.random.normal(kx, (2, 4, 16, 16), dtype=jnp.float32)

    # Case 1: standard conv block -- CNNBlock(4, 8, kernel_size=3, stride=1, padding=1)
    w1, g1, b1 = _make_params(kp1, 4, 8, 3, groups=1)
    _check(x, w1, g1, b1, stride=1, padding=1, groups=1, exp_shape=(2, 8, 16, 16))

    # Case 2: depthwise conv block -- CNNBlock(4, 4, kernel_size=3, stride=2, padding=1, groups=4)
    w2, g2, b2 = _make_params(kp2, 4, 4, 3, groups=4)
    _check(x, w2, g2, b2, stride=2, padding=1, groups=4, exp_shape=(2, 4, 8, 8))

    # Case 3: grouped conv with multiple M tiles and an M remainder (exercises the
    #         cross-tile stats reduction and the masked-tail path).
    x3 = jax.random.normal(kp3, (3, 4, 10, 10), dtype=jnp.float32)
    w3, g3, b3 = _make_params(jax.random.fold_in(kp3, 1), 4, 8, 3, groups=2)
    _check(x3, w3, g3, b3, stride=1, padding=1, groups=2, tile_m=128,
           exp_shape=(3, 8, 10, 10))

    print("KERNEL_OK")
</pallas_src>

<mosaic_0001>
module attributes {stable_mosaic.version = 11 : i64} {
  func.func @_conv_stats_kernel(%arg0: i32, %arg1: memref<512x36xbf16, #tpu.memory_space<vmem>>, %arg2: memref<36x8xbf16, #tpu.memory_space<vmem>>, %arg3: memref<512x8xf32, #tpu.memory_space<vmem>>, %arg4: memref<1x2x8xf32, #tpu.memory_space<vmem>>) attributes {dimension_semantics = [#tpu.dimension_semantics<parallel>], iteration_bounds = array<i64: 1>, scalar_prefetch = 0 : i64, scratch_operands = 0 : i64, tpu.core_type = #tpu.core_type<tc>, window_params = [{transform_indices = @transform_0, window_bounds = array<i64: 512, 36>}, {pipeline_mode = #tpu.pipeline_mode<synchronous>, transform_indices = @transform_1, window_bounds = array<i64: 36, 8>}, {transform_indices = @transform_2, window_bounds = array<i64: 512, 8>}, {transform_indices = @transform_3, window_bounds = array<i64: 1, 2, 8>}]} {
    %c0 = arith.constant 0 : index
    %c0_0 = arith.constant 0 : index
    %0 = vector.load %arg1[%c0, %c0_0] : memref<512x36xbf16, #tpu.memory_space<vmem>>, vector<512x36xbf16>
    %c0_1 = arith.constant 0 : index
    %c0_2 = arith.constant 0 : index
    %1 = vector.load %arg2[%c0_1, %c0_2] : memref<36x8xbf16, #tpu.memory_space<vmem>>, vector<36x8xbf16>
    %cst = arith.constant dense<0.000000e+00> : vector<512x8xf32>
    %2 = tpu.matmul %0, %1, %cst {dimension_numbers = #tpu.dot_dimension_numbers<[1], [0], [0], [1], [0, 0, 1, 1], [], []>} : vector<512x36xbf16>, vector<36x8xbf16>, vector<512x8xf32> -> vector<512x8xf32>
    %c0_3 = arith.constant 0 : index
    %c0_4 = arith.constant 0 : index
    %3 = vector.load %arg3[%c0_3, %c0_4] : memref<512x8xf32, #tpu.memory_space<vmem>>, vector<512x8xf32>
    tpu.vector_store %arg3[%c0_3, %c0_4], %2 {strides = array<i32>} : memref<512x8xf32, #tpu.memory_space<vmem>>, vector<512x8xf32>,
    %c512_i32 = arith.constant 512 : i32
    %4 = arith.muli %arg0, %c512_i32 : i32
    %5 = tpu.iota {dimensions = array<i32: 0>} : vector<512x1xi32>
    %6 = vector.broadcast %4 : i32 to vector<512x1xi32>
    %7 = arith.addi %6, %5 : vector<512x1xi32>
    %c512_i32_5 = arith.constant 512 : i32
    %8 = vector.broadcast %c512_i32_5 : i32 to vector<512x1xi32>
    %9 = arith.cmpi slt, %7, %8 : vector<512x1xi32>
    %cst_6 = arith.constant 0.000000e+00 : f32
    %10 = vector.shape_cast %9 : vector<512x1xi1> to vector<512x1xi1>
    %11 = vector.broadcast %10 : vector<512x1xi1> to vector<512x8xi1>
    %12 = vector.broadcast %cst_6 : f32 to vector<512x8xf32>
    %13 = arith.select %11, %2, %12 : vector<512x8xi1>, vector<512x8xf32>
    %cst_7 = arith.constant dense<0.000000e+00> : vector<8xf32>
    %14 = vector.multi_reduction <add>, %13, %cst_7 [0] : vector<512x8xf32> to vector<8xf32>
    %15 = vector.shape_cast %14 : vector<8xf32> to vector<1x8xf32>
    %16 = arith.mulf %13, %13 : vector<512x8xf32>
    %cst_8 = arith.constant dense<0.000000e+00> : vector<8xf32>
    %17 = vector.multi_reduction <add>, %16, %cst_8 [0] : vector<512x8xf32> to vector<8xf32>
    %18 = vector.shape_cast %17 : vector<8xf32> to vector<1x8xf32>
    %19 = tpu.concatenate %15, %18 in 0 : vector<1x8xf32>, vector<1x8xf32> -> vector<2x8xf32>
    %c0_9 = arith.constant 0 : index
    %c0_10 = arith.constant 0 : index
    %c0_11 = arith.constant 0 : index
    %20 = vector.load %arg4[%c0_9, %c0_10, %c0_11] : memref<1x2x8xf32, #tpu.memory_space<vmem>>, vector<1x2x8xf32>
    %21 = vector.shape_cast %20 : vector<1x2x8xf32> to vector<2x8xf32>
    %22 = vector.shape_cast %19 : vector<2x8xf32> to vector<1x2x8xf32>
    tpu.vector_store %arg4[%c0_9, %c0_10, %c0_11], %22 {strides = array<i32>} : memref<1x2x8xf32, #tpu.memory_space<vmem>>, vector<1x2x8xf32>,
    return
  }
  func.func @transform_0(%arg0: i32) -> (i32, i32) {
    %c0_i32 = arith.constant 0 : i32
    %c0_i32_0 = arith.constant 0 : i32
    return %arg0, %c0_i32 : i32, i32
  }
  func.func @transform_1(%arg0: i32) -> (i32, i32) {
    %c0_i32 = arith.constant 0 : i32
    %c0_i32_0 = arith.constant 0 : i32
    %c0_i32_1 = arith.constant 0 : i32
    return %c0_i32, %c0_i32_0 : i32, i32
  }
  func.func @transform_2(%arg0: i32) -> (i32, i32) {
    %c0_i32 = arith.constant 0 : i32
    %c0_i32_0 = arith.constant 0 : i32
    return %arg0, %c0_i32 : i32, i32
  }
  func.func @transform_3(%arg0: i32) -> (i32, i32, i32) {
    %c0_i32 = arith.constant 0 : i32
    %c0_i32_0 = arith.constant 0 : i32
    %c0_i32_1 = arith.constant 0 : i32
    return %arg0, %c0_i32, %c0_i32_0 : i32, i32, i32
  }
}

</mosaic_0001>

<bundles_post_ra>
// kernel: tpu_custom_call.1
= control target key start
LH: loop header
LB: loop body
LE: loop exit
PB: predicated region body
PF: predicated region fallthrough
CT: control target
= control target key end

     0   :  { %vm356_vm0 = vcmask 1041408   ;;  %vm259_vm1 = vcmask 293888   ;;  %s2428_s0 = inlined_call_operand.vmem [shape: bf16[512,36], index: 0, kind: input, shape index: {}]   ;;  %s2429_s1 = inlined_call_operand.vmem [shape: bf16[36,8], index: 1, kind: input, shape index: {}]   ;;  %s2430_s2 = inlined_call_operand.vmem [shape: f32[512,8], index: 2, kind: output, shape index: {0}]   ;;  %s2431_s3 = inlined_call_operand.hbm [shape: f32[1,2,8], index: 3, kind: output, shape index: {1}]  }
   0x1   :  { %v1634_v0 = vld [vmem:[%s2429_s1 + $0x10] ss:$0 sps:$4 sm:$0x33]   ;;  %v1635_v1 = vld [vmem:[%s2429_s1 + $0x8] sm:$0xff]   ;;  %v1637_v3 = vld [vmem:[%s2428_s0] sm:$0xff]  }
   0x2   :  { %1631 = vmatprep.subr.msk.bf16.mxu0 %vm356_vm0, %v1634_v0  ;;  %v358_v2 = vsel %vm356_vm0, %v1634_v0, 0  ;;  %1632 = vmatprep.subr.msk.bf16.mxu1 %vm356_vm0, %v1634_v0  ;;  %v1636_v4 = vld [vmem:[%s2429_s1] sm:$0xff]   ;;  %v1638_v5 = vld [vmem:[%s2428_s0 + $0x8] sm:$0xff]   ;;  %v1639_v6 = vld [vmem:[%s2428_s0 + $0x10] sm:$0xff]  }
   0x3   :  { %1556 = vmatpush3.bf16.msra.mxu0 %v358_v2  ;;  %1628 = vmatpush3.bf16.msra.mxu1 %v358_v2  ;;  %v1640_v7 = vld [vmem:[%s2428_s0 + $0x18] sm:$0xff]   ;;  %v1641_v8 = vld [vmem:[%s2428_s0 + $0x20] sm:$0xff]   ;;  %v1654_v10 = vld [vmem:[%s2428_s0 + $0x88] sm:$0xff]  }
   0x4   :  { %1557 = vmatprep.subr.bf16.mxu0 %v1635_v1  ;;  %1626 = vmatprep.subr.bf16.mxu1 %v1635_v1  ;;  %v1653_v9 = vld [vmem:[%s2428_s0 + $0x80] sm:$0xff]   ;;  %v1655_v11 = vld [vmem:[%s2428_s0 + $0x90] sm:$0xff]   ;;  %v1642_v12 = vld [vmem:[%s2428_s0 + $0x28] sm:$0xff]  }
   0x5   :  { %1561 = vmatprep.mubr.msk.bf16.mxu0 %vm259_vm1, %v1637_v3  ;;  %1593 = vmatprep.mubr.msk.bf16.mxu1 %vm259_vm1, %v1653_v9  ;;  %v1643_v13 = vld [vmem:[%s2428_s0 + $0x30] sm:$0xff]   ;;  %v1656_v14 = vld [vmem:[%s2428_s0 + $0x98] sm:$0xff]   ;;  %v1657_v15 = vld [vmem:[%s2428_s0 + $0xa0] sm:$0xff]  }
   0x6   :  { %v1644_v16 = vld [vmem:[%s2428_s0 + $0x38] sm:$0xff]   ;;  %v1658_v17 = vld [vmem:[%s2428_s0 + $0xa8] sm:$0xff]   ;;  %v1645_v18 = vld [vmem:[%s2428_s0 + $0x40] sm:$0xff]  }
   0x7   :  { %1558 = vmatpush3.bf16.msra.mxu0 %v1635_v1  ;;  %1629 = vmatpush3.bf16.msra.mxu1 %v1635_v1  ;;  %v1659_v19 = vld [vmem:[%s2428_s0 + $0xb0] sm:$0xff]  }
   0x8   :  { %1559 = vmatprep.subr.bf16.mxu0 %v1636_v4  ;;  %1627 = vmatprep.subr.bf16.mxu1 %v1636_v4 }
   0xb   :  { %1560 = vmatpush3.bf16.msra.mxu0 %v1636_v4  ;;  %1630 = vmatpush3.bf16.msra.mxu1 %v1636_v4 }
   0xe   :  { %1562 = vmatmul.mubr.msk.bf16.vlgmr.msra.gmra.mxu0 %vm259_vm1, %v1638_v5  ;;  %1594 = vmatmul.mubr.msk.bf16.vlgmr.msra.gmra.mxu1 %vm259_vm1, %v1654_v10 }
   0xf   :  { %1565 = vmatprep.mubr.msk.bf16.mxu0 %vm259_vm1, %v1639_v6  ;;  %1597 = vmatprep.mubr.msk.bf16.mxu1 %vm259_vm1, %v1655_v11 }
  0x16   :  { %1566 = vmatmul.mubr.msk.bf16.gmra.mxu0 %vm259_vm1, %v1640_v7  ;;  %1598 = vmatmul.mubr.msk.bf16.gmra.mxu1 %vm259_vm1, %v1656_v14 }
  0x17   :  { %1569 = vmatprep.mubr.msk.bf16.mxu0 %vm259_vm1, %v1641_v8  ;;  %1601 = vmatprep.mubr.msk.bf16.mxu1 %vm259_vm1, %v1657_v15 }
  0x1e   :  { %1570 = vmatmul.mubr.msk.bf16.gmra.mxu0 %vm259_vm1, %v1642_v12 }
  0x1f   :  { %1573 = vmatprep.mubr.msk.bf16.mxu0 %vm259_vm1, %v1643_v13 }
  0x20   :  { %9 = vsyncpa [#allocation3], 0  ;;  %1602 = vmatmul.mubr.msk.bf16.gmra.mxu1 %vm259_vm1, %v1658_v17  ;;  %v1646_v20 = vld [vmem:[%s2428_s0 + $0x48] sm:$0xff]   ;;  %v1660_v21 = vld [vmem:[%s2428_s0 + $0xb8] sm:$0xff]   ;;  %vm649_vm2 = vcmask 64512   ;;  %vm1431_vm3 = vcmask 1040384  }
  0x21   :  { %1605 = vmatprep.mubr.msk.bf16.mxu1 %vm259_vm1, %v1659_v19  ;;  %v1647_v22 = vld [vmem:[%s2428_s0 + $0x50] sm:$0xff]   ;;  %v1661_v23 = vld [vmem:[%s2428_s0 + $0xc0] sm:$0xff]   ;;  %v1648_v24 = vld [vmem:[%s2428_s0 + $0x58] sm:$0xff]   ;;  %vm1433_vm4 = vcmask 58368  }
  0x22   :  { %v1662_v25 = vld [vmem:[%s2428_s0 + $0xc8] sm:$0xff]   ;;  %v1649_v26 = vld [vmem:[%s2428_s0 + $0x60] sm:$0xff]   ;;  %v1663_v27 = vld [vmem:[%s2428_s0 + $0xd0] sm:$0xff]  }
  0x23   :  { %v1650_v28 = vld [vmem:[%s2428_s0 + $0x68] sm:$0xff]   ;;  %v1664_v29 = vld [vmem:[%s2428_s0 + $0xd8] sm:$0xff]   ;;  %v1651_v30 = vld [vmem:[%s2428_s0 + $0x70] sm:$0xff]  }
  0x24   :  { %v1665_v31 = vld [vmem:[%s2428_s0 + $0xe0] sm:$0xff]   ;;  %v1652_v32 = vld [vmem:[%s2428_s0 + $0x78] sm:$0xff]   ;;  %v1666_v33 = vld [vmem:[%s2428_s0 + $0xe8] sm:$0xff]  }
  0x25   :  { %v1667_v34 = vld [vmem:[%s2428_s0 + $0xf0] sm:$0xff]   ;;  %v1668_v35 = vld [vmem:[%s2428_s0 + $0xf8] sm:$0xff]  }
  0x26   :  { %1574 = vmatmul.mubr.msk.bf16.gmra.mxu0 %vm259_vm1, %v1644_v16 }
  0x27   :  { %1577 = vmatprep.mubr.msk.bf16.mxu0 %vm259_vm1, %v1645_v18 }
  0x28   :  { %1606 = vmatmul.mubr.msk.bf16.gmra.mxu1 %vm259_vm1, %v1660_v21 }
  0x29   :  { %1609 = vmatprep.mubr.msk.bf16.mxu1 %vm259_vm1, %v1661_v23 }
  0x2e   :  { %1578 = vmatmul.mubr.msk.bf16.gmra.mxu0 %vm259_vm1, %v1646_v20 }
  0x2f   :  { %1581 = vmatprep.mubr.msk.bf16.mxu0 %vm259_vm1, %v1647_v22 }
  0x30   :  { %1610 = vmatmul.mubr.msk.bf16.gmra.mxu1 %vm259_vm1, %v1662_v25 }
  0x31   :  { %1613 = vmatprep.mubr.msk.bf16.mxu1 %vm259_vm1, %v1663_v27 }
  0x36   :  { %1582 = vmatmul.mubr.msk.bf16.gmra.mxu0 %vm259_vm1, %v1648_v24 }
  0x37   :  { %1585 = vmatprep.mubr.msk.bf16.mxu0 %vm259_vm1, %v1649_v26 }
  0x38   :  { %1614 = vmatmul.mubr.msk.bf16.gmra.mxu1 %vm259_vm1, %v1664_v29 }
  0x39   :  { %1617 = vmatprep.mubr.msk.bf16.mxu1 %vm259_vm1, %v1665_v31 }
  0x3e   :  { %1586 = vmatmul.mubr.msk.bf16.gmra.mxu0 %vm259_vm1, %v1650_v28 }
  0x3f   :  { %1589 = vmatprep.mubr.msk.bf16.mxu0 %vm259_vm1, %v1651_v30 }
  0x40   :  { %1618 = vmatmul.mubr.msk.bf16.gmra.mxu1 %vm259_vm1, %v1666_v33 }
  0x41   :  { %1621 = vmatprep.mubr.msk.bf16.mxu1 %vm259_vm1, %v1667_v34 }
  0x46   :  { %1590 = vmatmul.mubr.msk.bf16.gmra.mxu0 %vm259_vm1, %v1652_v32 }
  0x48   :  { %1622 = vmatmul.mubr.msk.bf16.gmra.mxu1 %vm259_vm1, %v1668_v35 }
  0xce   :  { %v1563_v36 = vpop.f32.mrf.mxu0  ;;  %v1867_v47 = vpop.f32.mrf.mxu1 }
  0xcf   :  { %652 = vst.msk [vmem:[%s2430_s2 + $0x10] sm:$0xff] %vm649_vm2, %v1563_v36  ;;  %v1236_v41 = vmul.f32 %v1563_v36, %v1563_v36  ;;  %v1104_v48 = vsel %vm649_vm2, %v1563_v36, 0.0  ;;  %684 = vst.msk [vmem:[%s2430_s2 + $0x110] sm:$0xff] %vm649_vm2, %v1867_v47 }
  0xd0   :  { %v394_v37 = vpop.f32.mrf.mxu0  ;;  %v1881_v55 = vpop.f32.mrf.mxu1 }
  0xd1   :  { %650 = vst.msk [vmem:[%s2430_s2] sm:$0xff] %vm649_vm2, %v394_v37  ;;  %v1234_v39 = vmul.f32 %v394_v37, %v394_v37  ;;  %v1101_v42 = vsel %vm649_vm2, %v394_v37, 0.0  ;;  %v1301_v56 = vsel %vm649_vm2, %v1236_v41, 0.0  ;;  %682 = vst.msk [vmem:[%s2430_s2 + $0x100] sm:$0xff] %vm649_vm2, %v1881_v55 }
  0xd2   :  { %v1564_v38 = vpop.f32.mrf.mxu0  ;;  %v1894_v62 = vpop.f32.mrf.mxu1 }
  0xd3   :  { %653 = vst.msk [vmem:[%s2430_s2 + $0x18] sm:$0xff] %vm649_vm2, %v1564_v38  ;;  %v1298_v49 = vsel %vm649_vm2, %v1234_v39, 0.0  ;;  %v1237_v50 = vmul.f32 %v1564_v38, %v1564_v38  ;;  %v1106_v57 = vsel %vm649_vm2, %v1564_v38, 0.0  ;;  %685 = vst.msk [vmem:[%s2430_s2 + $0x118] sm:$0xff] %vm649_vm2, %v1894_v62 }
  0xd4   :  { %v397_v40 = vpop.f32.mrf.mxu0  ;;  %v1907_v4 = vpop.f32.mrf.mxu1 }
  0xd5   :  { %651 = vst.msk [vmem:[%s2430_s2 + $0x8] sm:$0xff] %vm649_vm2, %v397_v40  ;;  %v1102_v43 = vsel %vm649_vm2, %v397_v40, 0.0  ;;  %v1235_v44 = vmul.f32 %v397_v40, %v397_v40  ;;  %v1303_v63 = vsel %vm649_vm2, %v1237_v50, 0.0  ;;  %683 = vst.msk [vmem:[%s2430_s2 + $0x108] sm:$0xff] %vm649_vm2, %v1907_v4 }
  0xd6   :  { %v1103_v45 = vadd.f32 %v1102_v43, %v1101_v42  ;;  %v1567_v46 = vpop.f32.mrf.mxu0  ;;  %v1920_v12 = vpop.f32.mrf.mxu1 }
  0xd7   :  { %v1299_v51 = vsel %vm649_vm2, %v1235_v44, 0.0  ;;  %656 = vst.msk [vmem:[%s2430_s2 + $0x30] sm:$0xff] %vm649_vm2, %v1567_v46  ;;  %v1240_v5 = vmul.f32 %v1567_v46, %v1567_v46  ;;  %v1112_v13 = vsel %vm649_vm2, %v1567_v46, 0.0  ;;  %688 = vst.msk [vmem:[%s2430_s2 + $0x130] sm:$0xff] %vm649_vm2, %v1920_v12 }
  0xd8   :  { %v1105_v52 = vadd.f32 %v1104_v48, %v1103_v45  ;;  %v1300_v53 = vadd.f32 %v1299_v51, %v1298_v49  ;;  %v410_v54 = vpop.f32.mrf.mxu0  ;;  %v1933_v19 = vpop.f32.mrf.mxu1 }
  0xd9   :  { %654 = vst.msk [vmem:[%s2430_s2 + $0x20] sm:$0xff] %vm649_vm2, %v410_v54  ;;  %v1238_v58 = vmul.f32 %v410_v54, %v410_v54  ;;  %v1108_v0 = vsel %vm649_vm2, %v410_v54, 0.0  ;;  %v1309_v20 = vsel %vm649_vm2, %v1240_v5, 0.0  ;;  %686 = vst.msk [vmem:[%s2430_s2 + $0x120] sm:$0xff] %vm649_vm2, %v1933_v19 }
  0xda   :  { %v1302_v59 = vadd.f32 %v1301_v56, %v1300_v53  ;;  %v1107_v60 = vadd.f32 %v1106_v57, %v1105_v52  ;;  %v1568_v61 = vpop.f32.mrf.mxu0  ;;  %v1946_v26 = vpop.f32.mrf.mxu1 }
  0xdb   :  { %657 = vst.msk [vmem:[%s2430_s2 + $0x38] sm:$0xff] %vm649_vm2, %v1568_v61  ;;  %v1305_v6 = vsel %vm649_vm2, %v1238_v58, 0.0  ;;  %v1241_v14 = vmul.f32 %v1568_v61, %v1568_v61  ;;  %v1114_v21 = vsel %vm649_vm2, %v1568_v61, 0.0  ;;  %689 = vst.msk [vmem:[%s2430_s2 + $0x138] sm:$0xff] %vm649_vm2, %v1946_v26 }
  0xdc   :  { %v1109_v1 = vadd.f32 %v1108_v0, %v1107_v60  ;;  %v1304_v2 = vadd.f32 %v1303_v63, %v1302_v59  ;;  %v413_v3 = vpop.f32.mrf.mxu0  ;;  %v1959_v32 = vpop.f32.mrf.mxu1 }
  0xdd   :  { %655 = vst.msk [vmem:[%s2430_s2 + $0x28] sm:$0xff] %vm649_vm2, %v413_v3  ;;  %v1110_v7 = vsel %vm649_vm2, %v413_v3, 0.0  ;;  %v1239_v8 = vmul.f32 %v413_v3, %v413_v3  ;;  %v1311_v27 = vsel %vm649_vm2, %v1241_v14, 0.0  ;;  %687 = vst.msk [vmem:[%s2430_s2 + $0x128] sm:$0xff] %vm649_vm2, %v1959_v32 }
  0xde   :  { %v1306_v9 = vadd.f32 %v1305_v6, %v1304_v2  ;;  %v1111_v10 = vadd.f32 %v1110_v7, %v1109_v1  ;;  %v1571_v11 = vpop.f32.mrf.mxu0 }
  0xdf   :  { %v1307_v15 = vsel %vm649_vm2, %v1239_v8, 0.0  ;;  %660 = vst.msk [vmem:[%s2430_s2 + $0x50] sm:$0xff] %vm649_vm2, %v1571_v11  ;;  %v1244_v33 = vmul.f32 %v1571_v11, %v1571_v11  ;;  %v1120_v41 = vsel %vm649_vm2, %v1571_v11, 0.0 }
  0xe0   :  { %v1113_v16 = vadd.f32 %v1112_v13, %v1111_v10  ;;  %v1308_v17 = vadd.f32 %v1307_v15, %v1306_v9  ;;  %v426_v18 = vpop.f32.mrf.mxu0  ;;  %v1972_v40 = vpop.f32.mrf.mxu1 }
  0xe1   :  { %658 = vst.msk [vmem:[%s2430_s2 + $0x40] sm:$0xff] %vm649_vm2, %v426_v18  ;;  %v1242_v22 = vmul.f32 %v426_v18, %v426_v18  ;;  %v1116_v28 = vsel %vm649_vm2, %v426_v18, 0.0  ;;  %692 = vst.msk [vmem:[%s2430_s2 + $0x150] sm:$0xff] %vm649_vm2, %v1972_v40  ;;  %v1317_v49 = vsel %vm649_vm2, %v1244_v33, 0.0 }
  0xe2   :  { %v1310_v23 = vadd.f32 %v1309_v20, %v1308_v17  ;;  %v1115_v24 = vadd.f32 %v1114_v21, %v1113_v16  ;;  %v1572_v25 = vpop.f32.mrf.mxu0  ;;  %v1985_v48 = vpop.f32.mrf.mxu1 }
  0xe3   :  { %661 = vst.msk [vmem:[%s2430_s2 + $0x58] sm:$0xff] %vm649_vm2, %v1572_v25  ;;  %v1313_v34 = vsel %vm649_vm2, %v1242_v22, 0.0  ;;  %v1245_v42 = vmul.f32 %v1572_v25, %v1572_v25  ;;  %v1122_v50 = vsel %vm649_vm2, %v1572_v25, 0.0  ;;  %690 = vst.msk [vmem:[%s2430_s2 + $0x140] sm:$0xff] %vm649_vm2, %v1985_v48 }
  0xe4   :  { %v1117_v29 = vadd.f32 %v1116_v28, %v1115_v24  ;;  %v1312_v30 = vadd.f32 %v1311_v27, %v1310_v23  ;;  %v429_v31 = vpop.f32.mrf.mxu0  ;;  %v1998_v56 = vpop.f32.mrf.mxu1 }
  0xe5   :  { %659 = vst.msk [vmem:[%s2430_s2 + $0x48] sm:$0xff] %vm649_vm2, %v429_v31  ;;  %v1118_v35 = vsel %vm649_vm2, %v429_v31, 0.0  ;;  %v1243_v36 = vmul.f32 %v429_v31, %v429_v31  ;;  %v1319_v57 = vsel %vm649_vm2, %v1245_v42, 0.0  ;;  %693 = vst.msk [vmem:[%s2430_s2 + $0x158] sm:$0xff] %vm649_vm2, %v1998_v56 }
  0xe6   :  { %v1314_v37 = vadd.f32 %v1313_v34, %v1312_v30  ;;  %v1119_v38 = vadd.f32 %v1118_v35, %v1117_v29  ;;  %v1575_v39 = vpop.f32.mrf.mxu0  ;;  %v2011_v63 = vpop.f32.mrf.mxu1 }
  0xe7   :  { %v1315_v43 = vsel %vm649_vm2, %v1243_v36, 0.0  ;;  %664 = vst.msk [vmem:[%s2430_s2 + $0x70] sm:$0xff] %vm649_vm2, %v1575_v39  ;;  %v1248_v0 = vmul.f32 %v1575_v39, %v1575_v39  ;;  %691 = vst.msk [vmem:[%s2430_s2 + $0x148] sm:$0xff] %vm649_vm2, %v2011_v63  ;;  %v1128_v9 = vsel %vm649_vm2, %v1575_v39, 0.0 }
  0xe8   :  { %v1121_v44 = vadd.f32 %v1120_v41, %v1119_v38  ;;  %v1316_v45 = vadd.f32 %v1315_v43, %v1314_v37  ;;  %v442_v46 = vpop.f32.mrf.mxu0  ;;  %v2024_v8 = vpop.f32.mrf.mxu1 }
  0xe9   :  { %662 = vst.msk [vmem:[%s2430_s2 + $0x60] sm:$0xff] %vm649_vm2, %v442_v46  ;;  %v1246_v51 = vmul.f32 %v442_v46, %v442_v46  ;;  %v1124_v58 = vsel %vm649_vm2, %v442_v46, 0.0  ;;  %696 = vst.msk [vmem:[%s2430_s2 + $0x170] sm:$0xff] %vm649_vm2, %v2024_v8  ;;  %v1325_v17 = vsel %vm649_vm2, %v1248_v0, 0.0 }
  0xea   :  { %v1318_v52 = vadd.f32 %v1317_v49, %v1316_v45  ;;  %v1123_v53 = vadd.f32 %v1122_v50, %v1121_v44  ;;  %v1576_v54 = vpop.f32.mrf.mxu0  ;;  %v2037_v16 = vpop.f32.mrf.mxu1 }
  0xeb   :  { %665 = vst.msk [vmem:[%s2430_s2 + $0x78] sm:$0xff] %vm649_vm2, %v1576_v54  ;;  %v1321_v1 = vsel %vm649_vm2, %v1246_v51, 0.0  ;;  %v1249_v10 = vmul.f32 %v1576_v54, %v1576_v54  ;;  %v1130_v18 = vsel %vm649_vm2, %v1576_v54, 0.0  ;;  %694 = vst.msk [vmem:[%s2430_s2 + $0x160] sm:$0xff] %vm649_vm2, %v2037_v16 }
  0xec   :  { %v1125_v59 = vadd.f32 %v1124_v58, %v1123_v53  ;;  %v1320_v60 = vadd.f32 %v1319_v57, %v1318_v52  ;;  %v445_v61 = vpop.f32.mrf.mxu0  ;;  %v2050_v24 = vpop.f32.mrf.mxu1 }
  0xed   :  { %663 = vst.msk [vmem:[%s2430_s2 + $0x68] sm:$0xff] %vm649_vm2, %v445_v61  ;;  %v1126_v2 = vsel %vm649_vm2, %v445_v61, 0.0  ;;  %v1247_v3 = vmul.f32 %v445_v61, %v445_v61  ;;  %v1327_v25 = vsel %vm649_vm2, %v1249_v10, 0.0  ;;  %697 = vst.msk [vmem:[%s2430_s2 + $0x178] sm:$0xff] %vm649_vm2, %v2050_v24 }
  0xee   :  { %v1322_v5 = vadd.f32 %v1321_v1, %v1320_v60  ;;  %v1127_v6 = vadd.f32 %v1126_v2, %v1125_v59  ;;  %v1579_v7 = vpop.f32.mrf.mxu0  ;;  %v2063_v31 = vpop.f32.mrf.mxu1 }
  0xef   :  { %v1323_v11 = vsel %vm649_vm2, %v1247_v3, 0.0  ;;  %668 = vst.msk [vmem:[%s2430_s2 + $0x90] sm:$0xff] %vm649_vm2, %v1579_v7  ;;  %v1252_v33 = vmul.f32 %v1579_v7, %v1579_v7  ;;  %695 = vst.msk [vmem:[%s2430_s2 + $0x168] sm:$0xff] %vm649_vm2, %v2063_v31  ;;  %v1136_v42 = vsel %vm649_vm2, %v1579_v7, 0.0 }
  0xf0   :  { %v1129_v13 = vadd.f32 %v1128_v9, %v1127_v6  ;;  %v1324_v14 = vadd.f32 %v1323_v11, %v1322_v5  ;;  %v458_v15 = vpop.f32.mrf.mxu0  ;;  %v2076_v41 = vpop.f32.mrf.mxu1 }
  0xf1   :  { %666 = vst.msk [vmem:[%s2430_s2 + $0x80] sm:$0xff] %vm649_vm2, %v458_v15  ;;  %v1250_v20 = vmul.f32 %v458_v15, %v458_v15  ;;  %v1132_v27 = vsel %vm649_vm2, %v458_v15, 0.0  ;;  %700 = vst.msk [vmem:[%s2430_s2 + $0x190] sm:$0xff] %vm649_vm2, %v2076_v41  ;;  %v1333_v51 = vsel %vm649_vm2, %v1252_v33, 0.0 }
  0xf2   :  { %v1326_v21 = vadd.f32 %v1325_v17, %v1324_v14  ;;  %v1131_v22 = vadd.f32 %v1130_v18, %v1129_v13  ;;  %v1580_v23 = vpop.f32.mrf.mxu0  ;;  %v2089_v50 = vpop.f32.mrf.mxu1 }
  0xf3   :  { %669 = vst.msk [vmem:[%s2430_s2 + $0x98] sm:$0xff] %vm649_vm2, %v1580_v23  ;;  %v1329_v34 = vsel %vm649_vm2, %v1250_v20, 0.0  ;;  %v1253_v43 = vmul.f32 %v1580_v23, %v1580_v23  ;;  %v1138_v52 = vsel %vm649_vm2, %v1580_v23, 0.0  ;;  %698 = vst.msk [vmem:[%s2430_s2 + $0x180] sm:$0xff] %vm649_vm2, %v2089_v50 }
  0xf4   :  { %v1133_v28 = vadd.f32 %v1132_v27, %v1131_v22  ;;  %v1328_v29 = vadd.f32 %v1327_v25, %v1326_v21  ;;  %v461_v30 = vpop.f32.mrf.mxu0  ;;  %v2102_v59 = vpop.f32.mrf.mxu1 }
  0xf5   :  { %667 = vst.msk [vmem:[%s2430_s2 + $0x88] sm:$0xff] %vm649_vm2, %v461_v30  ;;  %v1134_v35 = vsel %vm649_vm2, %v461_v30, 0.0  ;;  %v1251_v36 = vmul.f32 %v461_v30, %v461_v30  ;;  %v1335_v60 = vsel %vm649_vm2, %v1253_v43, 0.0  ;;  %701 = vst.msk [vmem:[%s2430_s2 + $0x198] sm:$0xff] %vm649_vm2, %v2102_v59 }
  0xf6   :  { %v1330_v37 = vadd.f32 %v1329_v34, %v1328_v29  ;;  %v1135_v38 = vadd.f32 %v1134_v35, %v1133_v28  ;;  %v1583_v39 = vpop.f32.mrf.mxu0  ;;  %v2115_v3 = vpop.f32.mrf.mxu1 }
  0xf7   :  { %v1331_v44 = vsel %vm649_vm2, %v1251_v36, 0.0  ;;  %672 = vst.msk [vmem:[%s2430_s2 + $0xb0] sm:$0xff] %vm649_vm2, %v1583_v39  ;;  %v1256_v5 = vmul.f32 %v1583_v39, %v1583_v39  ;;  %699 = vst.msk [vmem:[%s2430_s2 + $0x188] sm:$0xff] %vm649_vm2, %v2115_v3  ;;  %v1144_v15 = vsel %vm649_vm2, %v1583_v39, 0.0 }
  0xf8   :  { %v1137_v45 = vadd.f32 %v1136_v42, %v1135_v38  ;;  %v1332_v46 = vadd.f32 %v1331_v44, %v1330_v37  ;;  %v474_v49 = vpop.f32.mrf.mxu0  ;;  %v2128_v14 = vpop.f32.mrf.mxu1 }
  0xf9   :  { %670 = vst.msk [vmem:[%s2430_s2 + $0xa0] sm:$0xff] %vm649_vm2, %v474_v49  ;;  %v1254_v53 = vmul.f32 %v474_v49, %v474_v49  ;;  %v1140_v61 = vsel %vm649_vm2, %v474_v49, 0.0  ;;  %704 = vst.msk [vmem:[%s2430_s2 + $0x1b0] sm:$0xff] %vm649_vm2, %v2128_v14  ;;  %v1341_v25 = vsel %vm649_vm2, %v1256_v5, 0.0 }
  0xfa   :  { %v1334_v54 = vadd.f32 %v1333_v51, %v1332_v46  ;;  %v1139_v57 = vadd.f32 %v1138_v52, %v1137_v45  ;;  %v1584_v58 = vpop.f32.mrf.mxu0  ;;  %v2141_v23 = vpop.f32.mrf.mxu1 }
  0xfb   :  { %673 = vst.msk [vmem:[%s2430_s2 + $0xb8] sm:$0xff] %vm649_vm2, %v1584_v58  ;;  %v1337_v6 = vsel %vm649_vm2, %v1254_v53, 0.0  ;;  %v1257_v17 = vmul.f32 %v1584_v58, %v1584_v58  ;;  %v1146_v27 = vsel %vm649_vm2, %v1584_v58, 0.0  ;;  %702 = vst.msk [vmem:[%s2430_s2 + $0x1a0] sm:$0xff] %vm649_vm2, %v2141_v23 }
  0xfc   :  { %v1141_v0 = vadd.f32 %v1140_v61, %v1139_v57  ;;  %v1336_v1 = vadd.f32 %v1335_v60, %v1334_v54  ;;  %v477_v2 = vpop.f32.mrf.mxu0  ;;  %v2154_v34 = vpop.f32.mrf.mxu1 }
  0xfd   :  { %671 = vst.msk [vmem:[%s2430_s2 + $0xa8] sm:$0xff] %vm649_vm2, %v477_v2  ;;  %v1142_v7 = vsel %vm649_vm2, %v477_v2, 0.0  ;;  %v1255_v9 = vmul.f32 %v477_v2, %v477_v2  ;;  %v1343_v35 = vsel %vm649_vm2, %v1257_v17, 0.0  ;;  %705 = vst.msk [vmem:[%s2430_s2 + $0x1b8] sm:$0xff] %vm649_vm2, %v2154_v34 }
  0xfe   :  { %v1338_v10 = vadd.f32 %v1337_v6, %v1336_v1  ;;  %v1143_v11 = vadd.f32 %v1142_v7, %v1141_v0  ;;  %v1587_v13 = vpop.f32.mrf.mxu0  ;;  %v2167_v42 = vpop.f32.mrf.mxu1 }
  0xff   :  { %v1339_v18 = vsel %vm649_vm2, %v1255_v9, 0.0  ;;  %676 = vst.msk [vmem:[%s2430_s2 + $0xd0] sm:$0xff] %vm649_vm2, %v1587_v13  ;;  %v1260_v43 = vmul.f32 %v1587_v13, %v1587_v13  ;;  %703 = vst.msk [vmem:[%s2430_s2 + $0x1a8] sm:$0xff] %vm649_vm2, %v2167_v42  ;;  %v1152_v54 = vsel %vm649_vm2, %v1587_v13, 0.0 }
 0x100   :  { %v1145_v20 = vadd.f32 %v1144_v15, %v1143_v11  ;;  %v1340_v21 = vadd.f32 %v1339_v18, %v1338_v10  ;;  %v490_v22 = vpop.f32.mrf.mxu0  ;;  %v2180_v53 = vpop.f32.mrf.mxu1 }
 0x101   :  { %674 = vst.msk [vmem:[%s2430_s2 + $0xc0] sm:$0xff] %vm649_vm2, %v490_v22  ;;  %v1258_v28 = vmul.f32 %v490_v22, %v490_v22  ;;  %v1148_v36 = vsel %vm649_vm2, %v490_v22, 0.0  ;;  %708 = vst.msk [vmem:[%s2430_s2 + $0x1d0] sm:$0xff] %vm649_vm2, %v2180_v53  ;;  %v1349_v2 = vsel %vm649_vm2, %v1260_v43, 0.0 }
 0x102   :  { %v1342_v29 = vadd.f32 %v1341_v25, %v1340_v21  ;;  %v1147_v30 = vadd.f32 %v1146_v27, %v1145_v20  ;;  %v1588_v33 = vpop.f32.mrf.mxu0  ;;  %v2193_v1 = vpop.f32.mrf.mxu1 }
 0x103   :  { %677 = vst.msk [vmem:[%s2430_s2 + $0xd8] sm:$0xff] %vm649_vm2, %v1588_v33  ;;  %v1345_v44 = vsel %vm649_vm2, %v1258_v28, 0.0  ;;  %v1261_v57 = vmul.f32 %v1588_v33, %v1588_v33  ;;  %v1154_v5 = vsel %vm649_vm2, %v1588_v33, 0.0  ;;  %706 = vst.msk [vmem:[%s2430_s2 + $0x1c0] sm:$0xff] %vm649_vm2, %v2193_v1 }
 0x104   :  { %v1149_v37 = vadd.f32 %v1148_v36, %v1147_v30  ;;  %v1344_v38 = vadd.f32 %v1343_v35, %v1342_v29  ;;  %v493_v39 = vpop.f32.mrf.mxu0  ;;  %v2206_v11 = vpop.f32.mrf.mxu1 }
 0x105   :  { %675 = vst.msk [vmem:[%s2430_s2 + $0xc8] sm:$0xff] %vm649_vm2, %v493_v39  ;;  %v1150_v45 = vsel %vm649_vm2, %v493_v39, 0.0  ;;  %v1259_v46 = vmul.f32 %v493_v39, %v493_v39  ;;  %v1351_v13 = vsel %vm649_vm2, %v1261_v57, 0.0  ;;  %709 = vst.msk [vmem:[%s2430_s2 + $0x1d8] sm:$0xff] %vm649_vm2, %v2206_v11  ;;  %v1164_v57 = vsel %vm649_vm2, %v1881_v55, 0.0 }
 0x106   :  { %v1346_v49 = vadd.f32 %v1345_v44, %v1344_v38  ;;  %v1151_v51 = vadd.f32 %v1150_v45, %v1149_v37  ;;  %v1591_v52 = vpop.f32.mrf.mxu0  ;;  %v2219_v21 = vpop.f32.mrf.mxu1 }
 0x107   :  { %v1347_v58 = vsel %vm649_vm2, %v1259_v46, 0.0  ;;  %680 = vst.msk [vmem:[%s2430_s2 + $0xf0] sm:$0xff] %vm649_vm2, %v1591_v52  ;;  %v1264_v22 = vmul.f32 %v1591_v52, %v1591_v52  ;;  %707 = vst.msk [vmem:[%s2430_s2 + $0x1c8] sm:$0xff] %vm649_vm2, %v2219_v21  ;;  %v1160_v35 = vsel %vm649_vm2, %v1591_v52, 0.0  ;;  %v1266_v46 = vmul.f32 %v1881_v55, %v1881_v55 }
 0x108   :  { %v1153_v60 = vadd.f32 %v1152_v54, %v1151_v51  ;;  %v1348_v61 = vadd.f32 %v1347_v58, %v1346_v49  ;;  %v506_v0 = vpop.f32.mrf.mxu0  ;;  %v2232_v33 = vpop.f32.mrf.mxu1  ;;  %v1267_v58 = vmul.f32 %v1907_v4, %v1907_v4  ;;  %v1166_v55 = vsel %vm649_vm2, %v1907_v4, 0.0 }
 0x109   :  { %678 = vst.msk [vmem:[%s2430_s2 + $0xe0] sm:$0xff] %vm649_vm2, %v506_v0  ;;  %v1262_v6 = vmul.f32 %v506_v0, %v506_v0  ;;  %v1156_v15 = vsel %vm649_vm2, %v506_v0, 0.0  ;;  %712 = vst.msk [vmem:[%s2430_s2 + $0x1f0] sm:$0xff] %vm649_vm2, %v2232_v33  ;;  %v1357_v44 = vsel %vm649_vm2, %v1264_v22, 0.0 }
 0x10a   :  { %v1350_v7 = vadd.f32 %v1349_v2, %v1348_v61  ;;  %v1155_v9 = vadd.f32 %v1154_v5, %v1153_v60  ;;  %v1592_v10 = vpop.f32.mrf.mxu0  ;;  %v2241_v43 = vpop.f32.mrf.mxu1  ;;  %v1268_v2 = vmul.f32 %v1867_v47, %v1867_v47  ;;  %v1361_v5 = vsel %vm649_vm2, %v1266_v46, 0.0 }
 0x10b   :  { %681 = vst.msk [vmem:[%s2430_s2 + $0xf8] sm:$0xff] %vm649_vm2, %v1592_v10  ;;  %v1353_v25 = vsel %vm649_vm2, %v1262_v6, 0.0  ;;  %v1265_v36 = vmul.f32 %v1592_v10, %v1592_v10  ;;  %v1162_v45 = vsel %vm649_vm2, %v1592_v10, 0.0  ;;  %710 = vst.msk [vmem:[%s2430_s2 + $0x1e0] sm:$0xff] %vm649_vm2, %v2241_v43  ;;  %v1269_v10 = vmul.f32 %v1894_v62, %v1894_v62 }
 0x10c   :  { %v1157_v17 = vadd.f32 %v1156_v15, %v1155_v9  ;;  %v1352_v18 = vadd.f32 %v1351_v13, %v1350_v7  ;;  %v509_v20 = vpop.f32.mrf.mxu0  ;;  %v2252_v52 = vpop.f32.mrf.mxu1  ;;  %v1168_v9 = vsel %vm649_vm2, %v1867_v47, 0.0  ;;  %v1363_v13 = vsel %vm649_vm2, %v1267_v58, 0.0 }
 0x10d   :  { %679 = vst.msk [vmem:[%s2430_s2 + $0xe8] sm:$0xff] %vm649_vm2, %v509_v20  ;;  %v1158_v27 = vsel %vm649_vm2, %v509_v20, 0.0  ;;  %v1263_v28 = vmul.f32 %v509_v20, %v509_v20  ;;  %v1359_v54 = vsel %vm649_vm2, %v1265_v36, 0.0  ;;  %713 = vst.msk [vmem:[%s2430_s2 + $0x1f8] sm:$0xff] %vm649_vm2, %v2252_v52  ;;  %v1365_v4 = vsel %vm649_vm2, %v1268_v2, 0.0 }
 0x10e   :  { %v1354_v29 = vadd.f32 %v1353_v25, %v1352_v18  ;;  %v1159_v30 = vadd.f32 %v1158_v27, %v1157_v17  ;;  %v2264_v0 = vpop.f32.mrf.mxu1  ;;  %v1170_v18 = vsel %vm649_vm2, %v1894_v62, 0.0  ;;  %v1270_v20 = vmul.f32 %v1933_v19, %v1933_v19 }
 0x10f   :  { %v1355_v37 = vsel %vm649_vm2, %v1263_v28, 0.0  ;;  %711 = vst.msk [vmem:[%s2430_s2 + $0x1e8] sm:$0xff] %vm649_vm2, %v2264_v0  ;;  %v1367_v27 = vsel %vm649_vm2, %v1269_v10, 0.0  ;;  %v1172_v47 = vsel %vm649_vm2, %v1933_v19, 0.0  ;;  %v1271_v28 = vmul.f32 %v1959_v32, %v1959_v32  ;;  %s1691_s2 = smov [#allocation2]  }
 0x110   :  { %v1161_v38 = vadd.f32 %v1160_v35, %v1159_v30  ;;  %v1356_v39 = vadd.f32 %v1355_v37, %v1354_v29  ;;  %v1272_v35 = vmul.f32 %v1920_v12, %v1920_v12  ;;  %v1369_v62 = vsel %vm649_vm2, %v1270_v20, 0.0  ;;  %s1443_s9 = sshll.u32 %s1691_s2, 4  ;;  %s1444_s9 = int_to_ptr.vmem [resolvable:$true] %s1443_s9 }
 0x111   :  { %v1174_v36 = vsel %vm649_vm2, %v1959_v32, 0.0  ;;  %v1273_v19 = vmul.f32 %v1946_v26, %v1946_v26  ;;  %v1274_v32 = vmul.f32 %v1985_v48, %v1985_v48  ;;  %s1669_s10 = scalar_lea.vmem %s1444_s9, 32  ;;  %p1674_p1 = scmp.lt.s32.totalorder %s1444_s9, %s1444_s9 }
 0x112   :  { %v1163_v49 = vadd.f32 %v1162_v45, %v1161_v38  ;;  %v1358_v51 = vadd.f32 %v1357_v44, %v1356_v39  ;;  %v1176_v39 = vsel %vm649_vm2, %v1920_v12, 0.0  ;;  %v1371_v44 = vsel %vm649_vm2, %v1271_v28, 0.0  ;;  %p1670_p0 = scmp.ne.s32.totalorder %s1444_s9, %s1669_s10  ;;  %p1675_p2 = scmp.lt.s32.totalorder %s1669_s10, %s1669_s10 }
 0x113   :  { %v1375_v58 = vsel %vm649_vm2, %v1273_v19, 0.0  ;;  %v1180_v12 = vsel %vm649_vm2, %v1985_v48, 0.0  ;;  %v1277_v48 = vmul.f32 %v1998_v56, %v1998_v56  ;;  %v1280_v28 = vmul.f32 %v2024_v8, %v2024_v8 }
 0x114   :  { %v1360_v60 = vadd.f32 %v1359_v54, %v1358_v51  ;;  %v1165_v61 = vadd.f32 %v1164_v57, %v1163_v49  ;;  %v1373_v49 = vsel %vm649_vm2, %v1272_v35, 0.0  ;;  %v1178_v51 = vsel %vm649_vm2, %v1946_v26, 0.0  ;;  %p1676_p3 = por %p1675_p2, %p1674_p1 }
 0x115   :  { %v1377_v26 = vsel %vm649_vm2, %v1274_v32, 0.0  ;;  %v1194_v19 = vsel %vm649_vm2, %v2050_v24, 0.0 }
 0x116   :  { %v1167_v6 = vadd.f32 %v1166_v55, %v1165_v61  ;;  %v1362_v7 = vadd.f32 %v1361_v5, %v1360_v60  ;;  %v1275_v60 = vmul.f32 %v2011_v63, %v2011_v63  ;;  %v1276_v5 = vmul.f32 %v1972_v40, %v1972_v40  ;;  %p1677_p4 = pnand %p1676_p3, %p1670_p0 }
 0x117   :  { %v1182_v55 = vsel %vm649_vm2, %v2011_v63, 0.0  ;;  %v1278_v63 = vmul.f32 %v2037_v16, %v2037_v16 }
 0x118   :  { %v1169_v15 = vadd.f32 %v1168_v9, %v1167_v6  ;;  %v1364_v17 = vadd.f32 %v1363_v13, %v1362_v7  ;;  %v1184_v9 = vsel %vm649_vm2, %v1972_v40, 0.0  ;;  %v1379_v10 = vsel %vm649_vm2, %v1275_v60, 0.0 }
 0x119   :  { %v1188_v40 = vsel %vm649_vm2, %v2037_v16, 0.0  ;;  %v1281_v16 = vmul.f32 %v2050_v24, %v2050_v24  ;;  %v1200_v60 = vsel %vm649_vm2, %v2076_v41, 0.0 }
 0x11a   :  { %v1366_v22 = vadd.f32 %v1365_v4, %v1364_v17  ;;  %v1171_v25 = vadd.f32 %v1170_v18, %v1169_v15  ;;  %v1381_v17 = vsel %vm649_vm2, %v1276_v5, 0.0  ;;  %v1186_v4 = vsel %vm649_vm2, %v1998_v56, 0.0 }
 0x11b   :  { %v1385_v56 = vsel %vm649_vm2, %v1278_v63, 0.0 }
 0x11c   :  { %v1173_v29 = vadd.f32 %v1172_v47, %v1171_v25  ;;  %v1368_v30 = vadd.f32 %v1367_v27, %v1366_v22  ;;  %v1383_v22 = vsel %vm649_vm2, %v1277_v48, 0.0  ;;  %v1279_v25 = vmul.f32 %v2063_v31, %v2063_v31 }
 0x11d   :  { %v1287_v48 = vmul.f32 %v2167_v42, %v2167_v42 }
 0x11e   :  { %v1370_v37 = vadd.f32 %v1369_v62, %v1368_v30  ;;  %v1175_v38 = vadd.f32 %v1174_v36, %v1173_v29  ;;  %v1190_v29 = vsel %vm649_vm2, %v2063_v31, 0.0  ;;  %v1192_v62 = vsel %vm649_vm2, %v2024_v8, 0.0 }
 0x11f   :  { %v1387_v36 = vsel %vm649_vm2, %v1279_v25, 0.0  ;;  %v1282_v31 = vmul.f32 %v2089_v50, %v2089_v50  ;;  %v1196_v8 = vsel %vm649_vm2, %v2089_v50, 0.0  ;;  %v1285_v50 = vmul.f32 %v2102_v59, %v2102_v59 }
 0x120   :  { %v1177_v45 = vadd.f32 %v1176_v39, %v1175_v38  ;;  %v1372_v46 = vadd.f32 %v1371_v44, %v1370_v37  ;;  %v1389_v39 = vsel %vm649_vm2, %v1280_v28, 0.0 }
 0x121   :  { %v1393_v24 = vsel %vm649_vm2, %v1282_v31, 0.0 }
 0x122   :  { %v1374_v54 = vadd.f32 %v1373_v49, %v1372_v46  ;;  %v1179_v57 = vadd.f32 %v1178_v51, %v1177_v45  ;;  %v1391_v46 = vsel %vm649_vm2, %v1281_v16, 0.0  ;;  %v1283_v49 = vmul.f32 %v2115_v3, %v2115_v3 }
 0x123   :  { %v1214_v16 = vsel %vm649_vm2, %v2219_v21, 0.0 }
 0x124   :  { %v1181_v61 = vadd.f32 %v1180_v12, %v1179_v57  ;;  %v1376_v2 = vadd.f32 %v1375_v58, %v1374_v54  ;;  %v1284_v54 = vmul.f32 %v2076_v41, %v2076_v41  ;;  %v1198_v57 = vsel %vm649_vm2, %v2115_v3, 0.0 }
 0x125   :  { %v1286_v3 = vmul.f32 %v2141_v23, %v2141_v23  ;;  %v1204_v41 = vsel %vm649_vm2, %v2141_v23, 0.0  ;;  %v1289_v23 = vmul.f32 %v2154_v34, %v2154_v34 }
 0x126   :  { %v1378_v6 = vadd.f32 %v1377_v26, %v1376_v2  ;;  %v1183_v7 = vadd.f32 %v1182_v55, %v1181_v61  ;;  %v1395_v61 = vsel %vm649_vm2, %v1283_v49, 0.0  ;;  %v1397_v26 = vsel %vm649_vm2, %v1284_v54, 0.0 }
 0x127   :  { %v1202_v55 = vsel %vm649_vm2, %v2102_v59, 0.0  ;;  %v1401_v59 = vsel %vm649_vm2, %v1286_v3, 0.0 }
 0x128   :  { %v1185_v13 = vadd.f32 %v1184_v9, %v1183_v7  ;;  %v1380_v15 = vadd.f32 %v1379_v10, %v1378_v6  ;;  %v1399_v9 = vsel %vm649_vm2, %v1285_v50, 0.0 }
 0x12a   :  { %v1382_v18 = vadd.f32 %v1381_v17, %v1380_v15  ;;  %v1187_v20 = vadd.f32 %v1186_v4, %v1185_v13  ;;  %v1288_v15 = vmul.f32 %v2128_v14, %v2128_v14  ;;  %v1206_v17 = vsel %vm649_vm2, %v2167_v42, 0.0 }
 0x12b   :  { %v1290_v42 = vmul.f32 %v2193_v1, %v2193_v1 }
 0x12c   :  { %v1189_v27 = vadd.f32 %v1188_v40, %v1187_v20  ;;  %v1384_v47 = vadd.f32 %v1383_v22, %v1382_v18  ;;  %v1208_v18 = vsel %vm649_vm2, %v2128_v14, 0.0  ;;  %v1403_v20 = vsel %vm649_vm2, %v1287_v48, 0.0 }
 0x12d   :  { %v1405_v25 = vsel %vm649_vm2, %v1288_v15, 0.0  ;;  %v1212_v14 = vsel %vm649_vm2, %v2193_v1, 0.0  ;;  %v1293_v1 = vmul.f32 %v2206_v11, %v2206_v11 }
 0x12e   :  { %v1386_v30 = vadd.f32 %v1385_v56, %v1384_v47  ;;  %v1191_v35 = vadd.f32 %v1190_v29, %v1189_v27  ;;  %v1210_v27 = vsel %vm649_vm2, %v2154_v34, 0.0  ;;  %v1407_v56 = vsel %vm649_vm2, %v1289_v23, 0.0 }
 0x12f   :  { %v1291_v29 = vmul.f32 %v2219_v21, %v2219_v21  ;;  %v1409_v34 = vsel %vm649_vm2, %v1290_v42, 0.0  ;;  %v1294_v21 = vmul.f32 %v2241_v43, %v2241_v43  ;;  %v1415_v49 = vsel %vm649_vm2, %v1293_v1, 0.0 }
 0x130   :  { %v1193_v37 = vadd.f32 %v1192_v62, %v1191_v35  ;;  %v1388_v38 = vadd.f32 %v1387_v36, %v1386_v30  ;;  %v1292_v62 = vmul.f32 %v2180_v53, %v2180_v53 }
 0x132   :  { %v1390_v44 = vadd.f32 %v1389_v39, %v1388_v38  ;;  %v1195_v45 = vadd.f32 %v1194_v19, %v1193_v37  ;;  %v1216_v38 = vsel %vm649_vm2, %v2180_v53, 0.0  ;;  %v1411_v39 = vsel %vm649_vm2, %v1291_v29, 0.0 }
 0x133   :  { %v1220_v53 = vsel %vm649_vm2, %v2241_v43, 0.0  ;;  %v1297_v43 = vmul.f32 %v2252_v52, %v2252_v52 }
 0x134   :  { %v1197_v51 = vadd.f32 %v1196_v8, %v1195_v45  ;;  %v1392_v32 = vadd.f32 %v1391_v46, %v1390_v44  ;;  %v1413_v44 = vsel %vm649_vm2, %v1292_v62, 0.0  ;;  %v1218_v45 = vsel %vm649_vm2, %v2206_v11, 0.0 }
 0x135   :  { %v1417_v11 = vsel %vm649_vm2, %v1294_v21, 0.0 }
 0x136   :  { %v1394_v58 = vadd.f32 %v1393_v24, %v1392_v32  ;;  %v1199_v12 = vadd.f32 %v1198_v57, %v1197_v51  ;;  %v1295_v51 = vmul.f32 %v2264_v0, %v2264_v0  ;;  %v1296_v24 = vmul.f32 %v2232_v33, %v2232_v33 }
 0x137   :  { %v1222_v57 = vsel %vm649_vm2, %v2264_v0, 0.0  ;;  %v1423_v0 = vsel %vm649_vm2, %v1297_v43, 0.0 }
 0x138   :  { %v1201_v2 = vadd.f32 %v1200_v60, %v1199_v12  ;;  %v1396_v5 = vadd.f32 %v1395_v61, %v1394_v58  ;;  %v1224_v60 = vsel %vm649_vm2, %v2232_v33, 0.0  ;;  %v1419_v50 = vsel %vm649_vm2, %v1295_v51, 0.0 }
 0x13a   :  { %v1398_v6 = vadd.f32 %v1397_v26, %v1396_v5  ;;  %v1203_v7 = vadd.f32 %v1202_v55, %v1201_v2  ;;  %v1421_v5 = vsel %vm649_vm2, %v1296_v24, 0.0  ;;  %v1226_v26 = vsel %vm649_vm2, %v2252_v52, 0.0 }
 0x13c   :  { %v1205_v10 = vadd.f32 %v1204_v41, %v1203_v7  ;;  %v1400_v13 = vadd.f32 %v1399_v9, %v1398_v6 }
 0x13e   :  { %v1402_v4 = vadd.f32 %v1401_v59, %v1400_v13  ;;  %v1207_v63 = vadd.f32 %v1206_v17, %v1205_v10 }
 0x140   :  { %v1209_v22 = vadd.f32 %v1208_v18, %v1207_v63  ;;  %v1404_v40 = vadd.f32 %v1403_v20, %v1402_v4 }
 0x142   :  { %v1406_v47 = vadd.f32 %v1405_v25, %v1404_v40  ;;  %v1211_v28 = vadd.f32 %v1210_v27, %v1209_v22 }
 0x144   :  { %v1213_v30 = vadd.f32 %v1212_v14, %v1211_v28  ;;  %v1408_v35 = vadd.f32 %v1407_v56, %v1406_v47 }
 0x146   :  { %v1410_v36 = vadd.f32 %v1409_v34, %v1408_v35  ;;  %v1215_v37 = vadd.f32 %v1214_v16, %v1213_v30 }
 0x148   :  { %v1217_v19 = vadd.f32 %v1216_v38, %v1215_v37  ;;  %v1412_v31 = vadd.f32 %v1411_v39, %v1410_v36 }
 0x14a   :  { %v1414_v46 = vadd.f32 %v1413_v44, %v1412_v31  ;;  %v1219_v8 = vadd.f32 %v1218_v45, %v1217_v19 }
 0x14c   :  { %v1221_v32 = vadd.f32 %v1220_v53, %v1219_v8  ;;  %v1416_v54 = vadd.f32 %v1415_v49, %v1414_v46 }
 0x14e   :  { %v1418_v58 = vadd.f32 %v1417_v11, %v1416_v54  ;;  %v1223_v12 = vadd.f32 %v1222_v57, %v1221_v32 }
 0x150   :  { %v1225_v61 = vadd.f32 %v1224_v60, %v1223_v12  ;;  %v1420_v2 = vadd.f32 %v1419_v50, %v1418_v58 }
 0x152   :  { %v1227_v55 = vadd.f32 %v1226_v26, %v1225_v61  ;;  %v1422_v3 = vadd.f32 %v1421_v5, %v1420_v2 }
 0x154   :  { %v1228_v6 = vrot.slane %v1227_v55, 4  ;;  %v1424_v7 = vadd.f32 %v1423_v0, %v1422_v3 }
 0x156   :  { %v1229_v9 = vadd.f32 %v1228_v6, %v1227_v55  ;;  %v1425_v33 = vrot.slane %v1424_v7, 4 }
 0x158   :  { %v1230_v41 = vrot.slane %v1229_v9, 2  ;;  %v1426_v48 = vadd.f32 %v1425_v33, %v1424_v7 }
 0x15a   :  { %v1231_v10 = vadd.f32 %v1230_v41, %v1229_v9  ;;  %v1427_v13 = vrot.slane %v1426_v48, 2 }
 0x15c   :  { %v1232_v15 = vrot.slane %v1231_v10, 1  ;;  %v1428_v59 = vadd.f32 %v1427_v13, %v1426_v48 }
 0x15e   :  { %v1429_v17 = vrot.slane %v1428_v59, 1  ;;  %v1233_v4 = vadd.f32 %v1232_v15, %v1231_v10 }
 0x160   :  { %v1430_v52 = vadd.f32 %v1429_v17, %v1428_v59 }
 0x162   :  { %v1432_v63 = vsel %vm1431_vm3, %v1233_v4, %v1430_v52 }
 0x163   :  { %1434 = vst.msk [vmem:[#allocation2] sm:$0x3] %vm1433_vm4, %v1432_v63 }
 0x164   :  { %1680 = shalt.err (!%p1677_p4)
}
 0x165   :  { %1446 = dma.vmem_to_hbm [thread:$0]  %s1444_s9, 32, %s2431_s3, [#allocation3]  }
 0x166   :  { %1689 = dma.done.wait [#allocation3], 32  }
 0x167   :  { %1690 = vsyncadd [#allocation3], 4294967264 }
 0x168   :  { %1452 = vsyncpa [#allocation3], 1 }

</bundles_post_ra>
